<compile_context>
chip_gen: v7x
topology: tpu7x:2x2x1
jax: 0.10.0
libtpu: 0.0.40
codegen_flags: <defaults>
</compile_context>

<pallas_src>
import functools
import math

import jax
import jax.numpy as jnp
from jax.experimental import pallas as pl
from jax.experimental.pallas import tpu as pltpu


def get_kernel_num(C, gamma=2, b=1):
    t = math.log2(C) / gamma + b / gamma
    floor = math.floor(t)
    return floor + (1 - floor % 2)


def _largest_divisor_leq(n, cap):
    cap = max(1, min(int(n), int(cap)))
    for d in range(cap, 0, -1):
        if n % d == 0:
            return d
    return 1


def _vmem_capacity_bytes():
    try:
        info = pltpu.get_tpu_info()
        cap = getattr(info, "vmem_capacity_bytes", None)
        if cap:
            return int(cap)
    except Exception:
        pass
    return 64 * 1024 * 1024  # conservative (v7x-sized) fallback


def _channel_attention_kernel(scal_ref, band_ref, x_ref, o_ref, sum_sc, max_sc, *,
                              hw, hw_tile, lanes, mask_tail):
    # scal_ref : SMEM (3,)  [(0.5+alpha)/HW, (0.5+beta), conv_bias]
    # band_ref : VMEM (C, C) precomputed conv1d band matrix (resident, constant index)
    # x_ref    : VMEM (Bt, C, hw_tile) activation tile (native dtype)
    # o_ref    : VMEM (Bt, 1, C) output block (revisited across the HW axis)
    # sum_sc   : VMEM (Bt, C, lanes) f32 lane-resident running sum
    # max_sc   : VMEM (Bt, C, lanes) native-dtype lane-resident running max
    kt = pl.program_id(1)
    last = pl.num_programs(1) - 1
    nchunks = hw_tile // lanes

    @pl.when(kt == 0)
    def _init():
        sum_sc[...] = jnp.zeros_like(sum_sc)
        max_sc[...] = jnp.full_like(max_sc, -jnp.inf)

    x = x_ref[...]                                        # (Bt, C, hw_tile)

    def accumulate(x_sum, x_max):
        s = sum_sc[...]
        m = max_sc[...]
        for j in range(nchunks):                          # static unroll, pure VPU
            lo = j * lanes
            s = s + x_sum[:, :, lo:lo + lanes].astype(jnp.float32)
            m = jnp.maximum(m, x_max[:, :, lo:lo + lanes])
        sum_sc[...] = s
        max_sc[...] = m

    if mask_tail:
        # Steady-state tiles: unmasked fast path.
        @pl.when(kt < last)
        def _steady():
            accumulate(x, x)

        # Only the final (partially out-of-bounds) tile pays for the mask.
        @pl.when(kt == last)
        def _tail():
            pos = kt * hw_tile + jax.lax.broadcasted_iota(
                jnp.int32, (1, 1, hw_tile), 2)
            valid = pos < hw
            zero = jnp.zeros((), x.dtype)
            ninf = jnp.array(-jnp.inf, dtype=x.dtype)
            accumulate(jnp.where(valid, x, zero), jnp.where(valid, x, ninf))
    else:
        accumulate(x, x)

    @pl.when(kt == last)
    def _finalize():
        # Single cross-lane reduce of the lane-resident accumulators.
        f_sum = jnp.sum(sum_sc[...], axis=-1)                        # (Bt, C) f32
        f_max = jnp.max(max_sc[...].astype(jnp.float32), axis=-1)    # (Bt, C) f32
        # f_add = (0.5+alpha)*avg + (0.5+beta)*max, with 1/HW folded into scal[0].
        f_add = scal_ref[0] * f_sum + scal_ref[1] * f_max
        # Zero-padded conv1d over channels as a tiny matmul with the hoisted band.
        conv = jnp.dot(f_add, band_ref[...],
                       preferred_element_type=jnp.float32) + scal_ref[2]
        att = jax.nn.sigmoid(conv).astype(o_ref.dtype)               # (Bt, C)
        o_ref[...] = att[:, None, :]                                 # (Bt, 1, C)


def channel_attention(x, conv_w, conv_b, alpha, beta, *,
                      batch_tile=None, hw_tile=None, buffers=2):
    """x: (B, C, H, W), float dtype. Returns (B, C, 1, 1) float32 attention."""
    B, C, H, W = x.shape
    HW = H * W
    k = int(conv_w.shape[0])
    pad = k // 2

    x_flat = x.reshape(B, C, HW)                    # free view; keep native dtype
    itemsize = jnp.dtype(x_flat.dtype).itemsize

    # ---- generation-aware VMEM budget -------------------------------------------
    vmem_cap = _vmem_capacity_bytes()
    usable = max(32 * 1024 * 1024, vmem_cap - 16 * 1024 * 1024)   # physical minus headroom
    target_bytes = (8 * 1024 * 1024 if vmem_cap <= 64 * 1024 * 1024    # v7x (64 MiB)
                    else 16 * 1024 * 1024)                             # v5e/v6e (128 MiB)

    # ---- batch packing: keep >=2 batch blocks when B >= 2 (v7x 2-TC parallelism) --
    lane_pref = HW if HW <= 128 else min((HW // 128) * 128, 512)
    if batch_tile is None:
        budget_rows = max(1, target_bytes // max(1, C * lane_pref * itemsize))
        if B <= 1:
            batch_tile = 1
            # TODO(synk): for B == 1 on v7x, core-split the HW reduction (2-wide leading
            # grid axis + partial sum/max outputs combined in the wrapper) so both TCs run.
        else:
            batch_tile = _largest_divisor_leq(B, min(B // 2, budget_rows))
    batch_tile = max(1, min(int(batch_tile), B))

    # ---- lane (HW) tile: multiple of 128 dividing HW when possible ---------------
    if hw_tile is None:
        if HW <= 128:
            hw_tile = HW
        else:
            cols_budget = max(
                128, (target_bytes // max(1, batch_tile * C * itemsize)) // 128 * 128)
            if HW % 128 == 0:
                d = _largest_divisor_leq(HW // 128, cols_budget // 128)
                hw_tile = 128 * d                           # divides HW -> no tail mask
            elif HW * batch_tile * C * itemsize <= target_bytes:
                hw_tile = HW                                # single full-extent tile
            else:
                hw_tile = min((HW // 128) * 128, cols_budget)   # masked tail (last step only)
    hw_tile = min(int(hw_tile), HW)

    num_bt = pl.cdiv(B, batch_tile)
    num_kt = pl.cdiv(HW, hw_tile)
    mask_tail = (HW % hw_tile) != 0
    lanes = 128 if hw_tile % 128 == 0 else hw_tile

    tile_bytes = batch_tile * C * hw_tile * itemsize
    scratch_bytes = batch_tile * C * lanes * (4 + itemsize)
    need = max(2, int(buffers)) * tile_bytes + scratch_bytes + 4 * 1024 * 1024
    vmem_limit = int(min(usable, max(32 * 1024 * 1024, need)))

    # Fold the combine scalars and the 1/HW mean scale in the wrapper.
    scal = jnp.stack([
        (0.5 + jnp.asarray(alpha, jnp.float32)) / jnp.float32(HW),
        0.5 + jnp.asarray(beta, jnp.float32),
        jnp.asarray(conv_b, jnp.float32),
    ])

    # Precompute the (C, C) band matrix of the zero-padded k-tap conv1d (hoisted out of
    # the kernel finalize): band[i, c] = w[i - c + pad] when in range, else 0.
    ch = jnp.arange(C)
    tap_idx = ch[:, None] - ch[None, :] + pad
    in_range = (tap_idx >= 0) & (tap_idx < k)
    band = jnp.where(in_range,
                     jnp.take(conv_w.astype(jnp.float32), jnp.clip(tap_idx, 0, k - 1)),
                     0.0)

    kernel = functools.partial(
        _channel_attention_kernel,
        hw=HW, hw_tile=hw_tile, lanes=lanes, mask_tail=mask_tail)

    max_dtype = x_flat.dtype  # running max is exact in the native float dtype

    x_spec_args = ((batch_tile, C, hw_tile), lambda b, kt: (b, 0, kt))
    if buffers and int(buffers) > 2:
        try:
            x_spec = pl.BlockSpec(*x_spec_args, pipeline_mode=pl.Buffered(int(buffers)))
        except TypeError:
            x_spec = pl.BlockSpec(*x_spec_args)
    else:
        x_spec = pl.BlockSpec(*x_spec_args)

    out = pl.pallas_call(
        kernel,
        out_shape=jax.ShapeDtypeStruct((B, 1, C), jnp.float32),
        grid=(num_bt, num_kt),
        in_specs=[
            pl.BlockSpec(memory_space=pltpu.MemorySpace.SMEM),          # scalars
            pl.BlockSpec((C, C), lambda b, kt: (0, 0)),                 # resident band
            x_spec,                                                     # streamed activations
        ],
        out_specs=pl.BlockSpec((batch_tile, 1, C), lambda b, kt: (b, 0, 0)),
        scratch_shapes=[
            pltpu.VMEM((batch_tile, C, lanes), jnp.float32),   # lane-resident running sum
            pltpu.VMEM((batch_tile, C, lanes), max_dtype),     # lane-resident running max
        ],
        compiler_params=pltpu.CompilerParams(
            dimension_semantics=("parallel", "arbitrary"),
            vmem_limit_bytes=vmem_limit),
    )(scal, band, x_flat)

    return out.reshape(B, C, 1, 1)


def channel_attention_ref(x, conv_w, conv_b, alpha, beta):
    """Pure-JAX reference mirroring the PyTorch forward."""
    B, C, H, W = x.shape
    k = conv_w.shape[0]
    pad = k // 2
    xf = x.astype(jnp.float32)
    f_avg = xf.mean(axis=(2, 3))                  # (B, C)
    f_max = xf.max(axis=(2, 3))                   # (B, C)
    f_add = 0.5 * (f_avg + f_max) + alpha * f_avg + beta * f_max
    padded = jnp.pad(f_add, ((0, 0), (pad, pad)))
    conv = jnp.stack(
        [(padded[:, c:c + k] * conv_w).sum(-1) for c in range(C)], axis=1
    ) + conv_b
    return jax.nn.sigmoid(conv).reshape(B, C, 1, 1)


if __name__ == "__main__":
    def run_case(B, C, H, W, key, dtype=jnp.float32, **tiling):
        k = get_kernel_num(C)
        kx, kw, kb = jax.random.split(key, 3)
        x = jax.random.normal(kx, (B, C, H, W), dtype=jnp.float32).astype(dtype)
        bound = 1.0 / math.sqrt(1 * k)
        conv_w = jax.random.uniform(kw, (k,), jnp.float32, minval=-bound, maxval=bound)
        conv_b = jax.random.uniform(kb, (), jnp.float32, minval=-bound, maxval=bound)
        alpha = jnp.float32(0.5)                  # nn.Parameter([0.5])
        beta = jnp.float32(0.5)                   # nn.Parameter([0.5])

        out = jax.block_until_ready(
            channel_attention(x, conv_w, conv_b, alpha, beta, **tiling))
        ref = channel_attention_ref(x, conv_w, conv_b, alpha, beta)
        assert out.shape == (B, C, 1, 1)
        assert jnp.allclose(out, ref, atol=1e-5, rtol=1e-5), \
            f"mismatch at {(B, C, H, W, dtype)}"

    key = jax.random.PRNGKey(0)
    k1, k2, k3 = jax.random.split(key, 3)

    # Single-step HW reduction (HW=256 in one lane-dense tile), 2 batch blocks (2 TCs).
    run_case(2, 16, 16, 16, k1)
    # Multi-step HW reduction with a GATED masked tail (HW=576, hw_tile=128 -> 5 steps).
    run_case(3, 16, 24, 24, k2, hw_tile=128)
    # bf16 streaming with native-dtype running max, HW < 128 (single narrow tile).
    run_case(2, 32, 8, 8, k3, dtype=jnp.bfloat16)

    print("KERNEL_OK")
</pallas_src>

<mosaic_0001>
module attributes {stable_mosaic.version = 11 : i64} {
  func.func @_channel_attention_kernel(%arg0: i32, %arg1: i32, %arg2: memref<3xf32, #tpu.memory_space<smem>>, %arg3: memref<16x16xf32, #tpu.memory_space<vmem>>, %arg4: memref<1x16x256xf32, #tpu.memory_space<vmem>>, %arg5: memref<1x1x16xf32, #tpu.memory_space<vmem>>, %arg6: memref<1x16x128xf32, #tpu.memory_space<vmem>>, %arg7: memref<1x16x128xf32, #tpu.memory_space<vmem>>) attributes {dimension_semantics = [#tpu.dimension_semantics<parallel>, #tpu.dimension_semantics<arbitrary>], iteration_bounds = array<i64: 2, 1>, scalar_prefetch = 0 : i64, scratch_operands = 2 : i64, tpu.core_type = #tpu.core_type<tc>, window_params = [{transform_indices = @transform_0, window_bounds = array<i64: 3>}, {pipeline_mode = #tpu.pipeline_mode<synchronous>, transform_indices = @transform_1, window_bounds = array<i64: 16, 16>}, {transform_indices = @transform_2, window_bounds = array<i64: 1, 16, 256>}, {transform_indices = @transform_3, window_bounds = array<i64: 1, 1, 16>}]} {
    %c0_i32 = arith.constant 0 : i32
    %0 = arith.cmpi eq, %arg1, %c0_i32 : i32
    %1 = arith.extui %0 : i1 to i32
    %c0_i32_0 = arith.constant 0 : i32
    %2 = arith.cmpi ne, %1, %c0_i32_0 : i32
    scf.if %2 {
      %cst = arith.constant 0.000000e+00 : f32
      %19 = vector.broadcast %cst : f32 to vector<1x16x128xf32>
      %c0_17 = arith.constant 0 : index
      %c0_18 = arith.constant 0 : index
      %c0_19 = arith.constant 0 : index
      %20 = vector.load %arg6[%c0_17, %c0_18, %c0_19] : memref<1x16x128xf32, #tpu.memory_space<vmem>>, vector<1x16x128xf32>
      tpu.vector_store %arg6[%c0_17, %c0_18, %c0_19], %19 {strides = array<i32>} : memref<1x16x128xf32, #tpu.memory_space<vmem>>, vector<1x16x128xf32>,
      %cst_20 = arith.constant 0xFF800000 : f32
      %21 = vector.broadcast %cst_20 : f32 to vector<1x16x128xf32>
      %c0_21 = arith.constant 0 : index
      %c0_22 = arith.constant 0 : index
      %c0_23 = arith.constant 0 : index
      %22 = vector.load %arg7[%c0_21, %c0_22, %c0_23] : memref<1x16x128xf32, #tpu.memory_space<vmem>>, vector<1x16x128xf32>
      tpu.vector_store %arg7[%c0_21, %c0_22, %c0_23], %21 {strides = array<i32>} : memref<1x16x128xf32, #tpu.memory_space<vmem>>, vector<1x16x128xf32>,
    } else {
    }
    %c0 = arith.constant 0 : index
    %c0_1 = arith.constant 0 : index
    %c0_2 = arith.constant 0 : index
    %3 = vector.load %arg4[%c0, %c0_1, %c0_2] : memref<1x16x256xf32, #tpu.memory_space<vmem>>, vector<1x16x256xf32>
    %c0_3 = arith.constant 0 : index
    %c0_4 = arith.constant 0 : index
    %c0_5 = arith.constant 0 : index
    %4 = vector.load %arg6[%c0_3, %c0_4, %c0_5] : memref<1x16x128xf32, #tpu.memory_space<vmem>>, vector<1x16x128xf32>
    %c0_6 = arith.constant 0 : index
    %c0_7 = arith.constant 0 : index
    %c0_8 = arith.constant 0 : index
    %5 = vector.load %arg7[%c0_6, %c0_7, %c0_8] : memref<1x16x128xf32, #tpu.memory_space<vmem>>, vector<1x16x128xf32>
    %6 = vector.extract_strided_slice %3 {offsets = [0, 0, 0], sizes = [1, 16, 128], strides = [1, 1, 1]} : vector<1x16x256xf32> to vector<1x16x128xf32>
    %7 = arith.addf %4, %6 : vector<1x16x128xf32>
    %8 = vector.extract_strided_slice %3 {offsets = [0, 0, 0], sizes = [1, 16, 128], strides = [1, 1, 1]} : vector<1x16x256xf32> to vector<1x16x128xf32>
    %9 = arith.maximumf %5, %8 : vector<1x16x128xf32>
    %10 = vector.extract_strided_slice %3 {offsets = [0, 0, 128], sizes = [1, 16, 128], strides = [1, 1, 1]} : vector<1x16x256xf32> to vector<1x16x128xf32>
    %11 = arith.addf %7, %10 : vector<1x16x128xf32>
    %12 = vector.extract_strided_slice %3 {offsets = [0, 0, 128], sizes = [1, 16, 128], strides = [1, 1, 1]} : vector<1x16x256xf32> to vector<1x16x128xf32>
    %13 = arith.maximumf %9, %12 : vector<1x16x128xf32>
    %c0_9 = arith.constant 0 : index
    %c0_10 = arith.constant 0 : index
    %c0_11 = arith.constant 0 : index
    %14 = vector.load %arg6[%c0_9, %c0_10, %c0_11] : memref<1x16x128xf32, #tpu.memory_space<vmem>>, vector<1x16x128xf32>
    tpu.vector_store %arg6[%c0_9, %c0_10, %c0_11], %11 {strides = array<i32>} : memref<1x16x128xf32, #tpu.memory_space<vmem>>, vector<1x16x128xf32>,
    %c0_12 = arith.constant 0 : index
    %c0_13 = arith.constant 0 : index
    %c0_14 = arith.constant 0 : index
    %15 = vector.load %arg7[%c0_12, %c0_13, %c0_14] : memref<1x16x128xf32, #tpu.memory_space<vmem>>, vector<1x16x128xf32>
    tpu.vector_store %arg7[%c0_12, %c0_13, %c0_14], %13 {strides = array<i32>} : memref<1x16x128xf32, #tpu.memory_space<vmem>>, vector<1x16x128xf32>,
    %c0_i32_15 = arith.constant 0 : i32
    %16 = arith.cmpi eq, %arg1, %c0_i32_15 : i32
    %17 = arith.extui %16 : i1 to i32
    %c0_i32_16 = arith.constant 0 : i32
    %18 = arith.cmpi ne, %17, %c0_i32_16 : i32
    scf.if %18 {
      %c0_17 = arith.constant 0 : index
      %c0_18 = arith.constant 0 : index
      %c0_19 = arith.constant 0 : index
      %19 = vector.load %arg6[%c0_17, %c0_18, %c0_19] : memref<1x16x128xf32, #tpu.memory_space<vmem>>, vector<1x16x128xf32>
      %cst = arith.constant dense<0.000000e+00> : vector<1x16xf32>
      %20 = vector.multi_reduction <add>, %19, %cst [2] : vector<1x16x128xf32> to vector<1x16xf32>
      %c0_20 = arith.constant 0 : index
      %c0_21 = arith.constant 0 : index
      %c0_22 = arith.constant 0 : index
      %21 = vector.load %arg7[%c0_20, %c0_21, %c0_22] : memref<1x16x128xf32, #tpu.memory_space<vmem>>, vector<1x16x128xf32>
      %cst_23 = arith.constant dense<0xFF800000> : vector<1x16xf32>
      %22 = vector.multi_reduction <maximumf>, %21, %cst_23 [2] : vector<1x16x128xf32> to vector<1x16xf32>
      %c0_24 = arith.constant 0 : index
      %23 = memref.load %arg2[%c0_24] : memref<3xf32, #tpu.memory_space<smem>>
      %24 = vector.broadcast %23 : f32 to vector<1x16xf32>
      %25 = arith.mulf %24, %20 : vector<1x16xf32>
      %c1 = arith.constant 1 : index
      %26 = memref.load %arg2[%c1] : memref<3xf32, #tpu.memory_space<smem>>
      %27 = vector.broadcast %26 : f32 to vector<1x16xf32>
      %28 = arith.mulf %27, %22 : vector<1x16xf32>
      %29 = arith.addf %25, %28 : vector<1x16xf32>
      %c0_25 = arith.constant 0 : index
      %c0_26 = arith.constant 0 : index
      %30 = vector.load %arg3[%c0_25, %c0_26] : memref<16x16xf32, #tpu.memory_space<vmem>>, vector<16x16xf32>
      %cst_27 = arith.constant dense<0.000000e+00> : vector<1x16xf32>
      %31 = tpu.matmul %29, %30, %cst_27 {dimension_numbers = #tpu.dot_dimension_numbers<[1], [0], [0], [1], [0, 0, 1, 1], [], []>} : vector<1x16xf32>, vector<16x16xf32>, vector<1x16xf32> -> vector<1x16xf32>
      %c2 = arith.constant 2 : index
      %32 = memref.load %arg2[%c2] : memref<3xf32, #tpu.memory_space<smem>>
      %33 = vector.broadcast %32 : f32 to vector<1x16xf32>
      %34 = arith.addf %31, %33 : vector<1x16xf32>
      %35 = arith.negf %34 : vector<1x16xf32>
      %36 = math.exp %35 : vector<1x16xf32>
      %cst_28 = arith.constant 1.000000e+00 : f32
      %37 = vector.broadcast %cst_28 : f32 to vector<1x16xf32>
      %38 = arith.addf %37, %36 : vector<1x16xf32>
      %39 = arith.divf %37, %38 : vector<1x16xf32>
      %40 = vector.shape_cast %39 : vector<1x16xf32> to vector<1x1x16xf32>
      %c0_29 = arith.constant 0 : index
      %c0_30 = arith.constant 0 : index
      %c0_31 = arith.constant 0 : index
      %41 = vector.load %arg5[%c0_29, %c0_30, %c0_31] : memref<1x1x16xf32, #tpu.memory_space<vmem>>, vector<1x1x16xf32>
      tpu.vector_store %arg5[%c0_29, %c0_30, %c0_31], %40 {strides = array<i32>} : memref<1x1x16xf32, #tpu.memory_space<vmem>>, vector<1x1x16xf32>,
    } else {
    }
    return
  }
  func.func @transform_0(%arg0: i32, %arg1: i32) -> i32 {
    %c0_i32 = arith.constant 0 : i32
    %c0_i32_0 = arith.constant 0 : i32
    return %c0_i32 : i32
  }
  func.func @transform_1(%arg0: i32, %arg1: i32) -> (i32, i32) {
    %c0_i32 = arith.constant 0 : i32
    %c0_i32_0 = arith.constant 0 : i32
    %c0_i32_1 = arith.constant 0 : i32
    return %c0_i32, %c0_i32_0 : i32, i32
  }
  func.func @transform_2(%arg0: i32, %arg1: i32) -> (i32, i32, i32) {
    %c0_i32 = arith.constant 0 : i32
    %c0_i32_0 = arith.constant 0 : i32
    return %arg0, %c0_i32, %arg1 : i32, i32, i32
  }
  func.func @transform_3(%arg0: i32, %arg1: i32) -> (i32, i32, i32) {
    %c0_i32 = arith.constant 0 : i32
    %c0_i32_0 = arith.constant 0 : i32
    %c0_i32_1 = arith.constant 0 : i32
    return %arg0, %c0_i32, %c0_i32_0 : i32, i32, i32
  }
}

</mosaic_0001>

<bundles_post_ra>
// kernel: tpu_custom_call.1
= control target key start
LH: loop header
LB: loop body
LE: loop exit
PB: predicated region body
PF: predicated region fallthrough
CT: control target
= control target key end

     0   :  { %8 = vsyncpa [#allocation7], 0  ;;  %s1063_s0 = inlined_call_operand.hbm [shape: f32[3], index: 0, kind: input, shape index: {}]   ;;  %s1064_s1 = inlined_call_operand.hbm [shape: f32[16,16], index: 1, kind: input, shape index: {}]   ;;  %s1065_s2 = inlined_call_operand.hbm [shape: f32[2,16,256], index: 2, kind: input, shape index: {}]   ;;  %s1066_s3 = inlined_call_operand.hbm [shape: f32[2,1,16], index: 3, kind: output, shape index: {}]  }
   0x1   :  { %9 = vsyncpa [#allocation5], 0 }
   0x2   :  { %10 = vsyncpa [#allocation10], 0 }
   0x3   :  { %12 = vsyncpa [#allocation10 + $0x1], 0 }
   0x4   :  { %13 = vsyncpa [#allocation6], 0 }
   0x5   :  { %15 = vsyncpa [#allocation6 + $0x1], 0  ;;  %s821_s12 = smov 0   ;;  %s823_s13 = smov 0  }
   0x6   :  { %s825_s14 = smov 0   ;;  %s827_s15 = smov 0  }
   0x7   :  { %s829_s16 = smov 0   ;;  %s831_s17 = smov 0  }
   0x8 LB: > { %s499_s18 = sadd.s32 4294967295, %s788_s17   ;;  %s500_s19 = sadd.s32 4294967294, %s788_s17   ;;  %s788_s17 = sphi %s831_s17, %s21_s17   ;;  %s784_s16 = sphi %s829_s16, %s1088_s16   ;;  %s780_s15 = sphi %s827_s15, %s1087_s15   ;;  %s776_s14 = sphi %s825_s14, %s1086_s14   ;;  %s772_s13 = sphi %s823_s13, %s1085_s13   ;;  %s768_s12 = sphi %s821_s12, %s1084_s12  }
   0x9   : > { %s84_s20 = sadd.s32 1, %s776_s14  ;;  %p91_p0 = scmp.ne.s32.totalorder %s776_s14, %s772_s13 }
   0xa   : > { %p92_p1 = scmp.eq.s32.totalorder %s788_s17, 0  ;;  %p97_p2 = scmp.ne.s32.totalorder %s772_s13, %s768_s12 }
   0xb   : > { %p859_p3 = scmp.eq.s32.totalorder %s499_s18, 0  ;;  %p121_p4 = scmp.eq.s32.totalorder %s499_s18, 1 }
   0xc   : > { %p93_p5 = por %p92_p1, %p91_p0  ;;  %p127_p6 = scmp.eq.s32.totalorder %s500_s19, 1 }
   0xd   : > { %s1071_s21 = scalar_select %p859_p3, 1, 0 }
   0xe   : > { %p865_p7 = por %p859_p3, %p97_p2  ;;  %p869_p8 = por %p121_p4, %p91_p0 }
   0xf   : > { %p873_p9 = por %p127_p6, %p97_p2  ;;  %p501_p10 = scmp.ge.s32.totalorder %s788_s17, 1 }
  0x10   : > { %s1072_s22 = scalar_select %p865_p7, 1, 0 }
  0x11   : > { %s1073_s23 = scalar_select %p869_p8, 1, 0 }
  0x12   : > { %s1074_s24 = scalar_select %p873_p9, 1, 0 }
  0x13   : > { %p134_p11 = scmp.lt.s32.totalorder %s788_s17, 3  ;;  %p562_p1 = scmp.lt.s32.totalorder %s788_s17, 2 }
  0x14   : > { %s790_s27 = smov [#allocation8]   ;;  %p1077_p0 = scmp.ne.s32.totalorder %s1071_s21, 0 }
  0x15   : > { %p880_p13 = pnand %p501_p10, %p134_p11  ;;  %p887_p7 = pnand %p562_p1, %p93_p5 }
  0x16   : > { %s155_s28 = sshll.u32 %s790_s27, 4  ;;  %s627_s5 = scalar_lea.hbm %s1063_s0, 16  ;;  %s897_s28 = int_to_ptr.vmem [resolvable:$true] %s155_s28 }
  0x17   : > { %p545_p3 = pneg %p880_p13  ;;  %p628_p4 = scmp.ne.s32.totalorder %s1063_s0, %s627_s5 }
  0x18   : > { %p634_p10 = scmp.lt.u32.totalorder %s627_s5, %s1063_s0 }
  0x19   : > { %p893_p2 = pnand %p545_p3, %p1077_p0 }
  0x1b   : > { %p629_p5 = pneg %p893_p2 }
  0x1d   : > { %p630_p3 = pnand %p629_p5, %p628_p4 }
  0x1f   : > { %p631_p6 = pneg %p630_p3 }
  0x21   : > { %p636_p11 = pnand %p634_p10, %p631_p6 }
  0x23   : > { %639 = shalt.err (!%p636_p11)
}
  0x24   : > { %s791_s10 = smov [#allocation4]   ;;  %s640_s30 = scalar_lea.hbm %s1064_s1, 256 }
  0x25   : > { %548 = dma.hbm_to_smem (!%p893_p2), %s1063_s0, 16, %s791_s10, [#allocation7]  }
  0x26   : > { %p641_p1 = scmp.ne.s32.totalorder %s1064_s1, %s640_s30  ;;  %p647_p3 = scmp.lt.u32.totalorder %s640_s30, %s1064_s1 }
  0x28   : > { %p643_p0 = pnand %p641_p1, %p629_p5 }
  0x2a   : > { %p644_p4 = pneg %p643_p0 }
  0x2c   : > { %p649_p6 = pnand %p647_p3, %p644_p4 }
  0x2e   : > { %652 = shalt.err (!%p649_p6)
}
  0x2f   : > { %s653_s8 = scalar_lea.vmem %s897_s28, 256  ;;  %p661_p9 = scmp.lt.s32.totalorder %s897_s28, %s897_s28 }
  0x30   : > { %p654_p10 = scmp.ne.s32.totalorder %s897_s28, %s653_s8  ;;  %p662_p1 = scmp.lt.s32.totalorder %s653_s8, %s653_s8 }
  0x32   : > { %p656_p11 = pnand %p654_p10, %p629_p5  ;;  %p663_p0 = por %p662_p1, %p661_p9 }
  0x34   : > { %p657_p12 = pneg %p656_p11 }
  0x36   : > { %p664_p8 = pnand %p663_p0, %p657_p12 }
  0x38   : > { %667 = shalt.err (!%p664_p8)
}
  0x39   : > { %s792_s9 = smov 128   ;;  %s793_s10 = smov 8  }
  0x3a   : > { %551 = dma.hbm_to_vmem [thread:$0]  (!%p893_p2), %s1064_s1, 256, %s897_s28, [#allocation5], %s792_s9, %s792_s9, %s793_s10  }
  0x3b   : > { %s33_s19 = sadd.s32 1, %s784_s16  ;;  %s169_s27 = sand.u32 1, %s776_s14  }
  0x3c   : > { %p35_p8 = scmp.ge.s32.totalorder %s33_s19, 2  ;;  %s505_s30 = sshll.u32 %s169_s27, 5 }
  0x3d   : > { %s519_s4 = sshll.u32 %s784_s16, 9  ;;  %s173_s28 = scalar_lea.vmem [#allocation9], %s505_s30 }
  0x3e   : > { %s1090_s19 = smov (%p35_p8, %s33_s19), 0  ;;  %s951_s7 = scalar_lea.hbm %s1065_s2, %s519_s4 }
  0x3f   : > { %s79_s29 = ssub.s32 %s784_s16, %s1090_s19  ;;  %s182_s8 = sshll.u32 %s173_s28, 4  ;;  %s955_s8 = int_to_ptr.vmem [resolvable:$true] %s182_s8 }
  0x40   : > { %p82_p9 = scmp.eq.s32.totalorder %s79_s29, 0  ;;  %s962_s10 = scalar_lea.sflag [#allocation10], %s169_s27 }
  0x41   : > { %s668_s11 = scalar_lea.hbm %s951_s7, 512  ;;  %p670_p2 = pneg %p887_p7 }
  0x42   : > { %s960_s9 = scalar_select %p82_p9, %s776_s14, %s84_s20  }
  0x43   : > { %p669_p12 = scmp.ne.s32.totalorder %s951_s7, %s668_s11  ;;  %s673_s30 = scalar_lea.hbm %s1065_s2, 1024 }
  0x44   : > { %p674_p3 = scmp.lt.u32.totalorder %s951_s7, %s1065_s2  ;;  %p675_p6 = scmp.lt.u32.totalorder %s673_s30, %s668_s11 }
  0x45   : > { %p671_p5 = pnand %p670_p2, %p669_p12  ;;  %p677_p11 = scmp.lt.u32.totalorder %s668_s11, %s951_s7 }
  0x46   : > { %p676_p10 = por %p675_p6, %p674_p3 }
  0x47   : > { %p672_p4 = pneg %p671_p5 }
  0x48   : > { %p678_p1 = por %p677_p11, %p676_p10 }
  0x4a   : > { %p679_p0 = pnand %p678_p1, %p672_p4 }
  0x4c   : > { %682 = shalt.err (!%p679_p0)
}
  0x4d   : > { %s683_s20 = scalar_lea.vmem %s955_s8, 512  ;;  %s794_s27 = smov [#allocation9]  }
  0x4e   : > { %p684_p8 = scmp.ne.s32.totalorder %s955_s8, %s683_s20  ;;  %s688_s29 = sshll.u32 %s794_s27, 4  ;;  %s689_s29 = int_to_ptr.vmem [resolvable:$false] %s688_s29 }
  0x4f   : > { %s690_s28 = scalar_lea.vmem %s689_s29, 1024  ;;  %p691_p5 = scmp.lt.s32.totalorder %s955_s8, %s689_s29 }
  0x50   : > { %p686_p9 = pnand %p684_p8, %p670_p2  ;;  %p692_p3 = scmp.lt.s32.totalorder %s690_s28, %s683_s20 }
  0x52   : > { %p687_p12 = pneg %p686_p9  ;;  %p693_p6 = por %p692_p3, %p691_p5 }
  0x54   : > { %p694_p10 = pnand %p693_p6, %p687_p12 }
  0x56   : > { %697 = shalt.err (!%p694_p10)
}
  0x57   : > { %s795_s11 = smov 256   ;;  %s796_s18 = smov 16  }
  0x58   : > { %555 = dma.hbm_to_vmem [thread:$0]  (!%p887_p7), %s951_s7, 512, %s955_s8, %s962_s10, %s795_s11, %s795_s11, %s796_s18  }
  0x59   : > { %194 = sbr.rel (%p880_p13) target bundleno = 515 (0x203), region = 32  ;;  %p1079_p2 = scmp.ne.s32.totalorder (!%p880_p13), %s1071_s21, 0 }
  0x60   : > { %751 = dma.done.wait (%p1079_p2), [#allocation7], 16  }
  0x61   : > { %753 = vsyncadd (%p1079_p2), [#allocation7], 4294967280 }
  0x62   : > { %755 = dma.done.wait (%p1079_p2), [#allocation5], 256  }
  0x63   : > { %757 = vsyncadd (%p1079_p2), [#allocation5], 4294967040  ;;  %s1001_s4 = sand.u32 1, %s772_s13   ;;  %p1080_p7 = scmp.ne.s32.totalorder %s1072_s22, 0 }
  0x64   : > { %s511_s25 = sshll.u32 %s1001_s4, 5  ;;  %s205_s26 = scalar_lea.sflag [#allocation10], %s1001_s4 }
  0x65   : > { %s208_s7 = scalar_lea.vmem [#allocation9], %s511_s25 }
  0x66   : > { %759 = dma.done.wait (%p1080_p7), %s205_s26, 512  }
  0x67   : > { %761 = vsyncadd (%p1080_p7), %s205_s26, 4294966784 }
  0x68   : > { %213 = sfence }
  0x69   : > { %v240_v0 = vld [vmem:[%s208_s7] sm:$0xff]  ;;  %v241_v1 = vld [vmem:[%s208_s7 + $0x8] sm:$0xff]  ;;  %v242_v2 = vld [vmem:[%s208_s7 + $0x10] sm:$0xff]  ;;  %v797_v11 = vmov 0.0|0.0   ;;  %vm798_vm0 = vmmov 0   ;;  %v799_v12 = vmov 0.0   ;;  %v291_v13 = vlaneseq }
  0x6a   : > { %v254_v3 = vmax.f32 %v240_v0, %v241_v1  ;;  %v252_v4 = vadd.f32 %v241_v1, %v240_v0  ;;  %v243_v5 = vld [vmem:[%s208_s7 + $0x18] sm:$0xff]  ;;  %v285_v8 = vld [vmem:[#allocation8] sm:$0xff]  ;;  %530 = vmatprep.subr.bf16.mxu0 %v797_v11  ;;  %527 = vmatprep.mubr.msk.f32.mxu0 %vm798_vm0, %v799_v12  ;;  %s512_s21 = sld [smem:[#allocation4 + $0x1]]  ;;  %s275_s22 = sld [smem:[#allocation4]]  ;;  %vm302_vm1 = vcmask 130112   ;;  %vm304_vm2 = vcmask 130048  }
  0x6b   : > { %v255_v6 = vmax.f32 %v242_v2, %v243_v5  ;;  %v253_v7 = vadd.f32 %v243_v5, %v242_v2  ;;  %v286_v9 = vld [vmem:[#allocation8 + $0x8] sm:$0xff]  ;;  %v292_v16 = vand.u32 127, %v291_v13  ;;  %v294_v18 = vshrl.u32 %v291_v13, 7  ;;  %s513_s8 = sld [smem:[#allocation4 + $0x2]]  ;;  %s516_s10 = sshll.u32 %s780_s15, 4 }
  0x6c   : > { %271 = vmax.xlane.f32.xlu1 %v254_v3  ;;  %265 = vadd.xlane.f32.xlu0 %v252_v4  ;;  %v531_v10 = vpack.c.bf16 %v286_v9, %v285_v8  ;;  %s230_s30 = scalar_lea.vmem [#allocation11], %s1001_s4  ;;  %vm383_vm3 = vcmask 122880   ;;  %s1014_s27 = scalar_lea.hbm %s1066_s3, %s516_s10 }
  0x6d   : > { %v297_v22 = vadd.s32 4294967288, %v292_v16  ;;  %v295_v23 = vsub.s32 %v292_v16, %v294_v18  ;;  %s398_s6 = sshll.u32 %s230_s30, 4  ;;  %s386_s29 = scalar_lea.sflag [#allocation6], %s1001_s4  ;;  %s1016_s6 = int_to_ptr.vmem [resolvable:$true] %s398_s6 }
  0x6e   : > { %532 = vmatpush3.bf16.msra.mxu0 %v531_v10  ;;  %s698_s28 = scalar_lea.vmem %s1016_s6, 16  ;;  %p1081_p4 = scmp.ne.s32.totalorder %s1073_s23, 0 }
  0x6f   : > { %v300_v28 = vsub.s32 %v297_v22, %v294_v18  ;;  %p699_p13 = scmp.ne.s32.totalorder %s1016_s6, %s698_s28  ;;  %s800_s15 = smov [#allocation11]  }
  0x70   : > { %273 = vmax.xlane.f32.xlu1 %v255_v6  ;;  %267 = vadd.xlane.f32.xlu0 %v253_v7  ;;  %v280_v14 = vstv %s512_s21  ;;  %v276_v15 = vstv %s275_s22  ;;  %s702_s11 = sshll.u32 %s800_s15, 4  ;;  %s703_s11 = int_to_ptr.vmem [resolvable:$false] %s702_s11 }
  0x71   : > { %v288_v34 = vstv %s513_s8  ;;  %p700_p11 = pnand %p699_p13, %p1081_p4  ;;  %s704_s18 = scalar_lea.vmem %s703_s11, 32 }
  0x72   : > { %p705_p0 = scmp.lt.s32.totalorder %s1016_s6, %s703_s11  ;;  %p706_p8 = scmp.lt.s32.totalorder %s704_s18, %s698_s28 }
  0x73   : > { %p701_p1 = pneg %p700_p11 }
  0x74   : > { %p707_p9 = por %p706_p8, %p705_p0 }
  0x76   : > { %p708_p12 = pnand %p707_p9, %p701_p1 }
  0xf9   : > { %v272_v17 = vpop.xlane.xlu1 %271  ;;  %v266_v19 = vpop.xlane.xlu0 %265 }
  0xfa   : > { %v281_v20 = vmul.f32 %v280_v14, %v272_v17  ;;  %v277_v21 = vmul.f32 %v276_v15, %v266_v19 }
  0xfc   : > { %v283_v26 = vadd.f32 %v281_v20, %v277_v21 }
  0xfd   : > { %v274_v24 = vpop.xlane.xlu1 %273  ;;  %v268_v25 = vpop.xlane.xlu0 %267 }
  0xfe   : > { %v282_v27 = vmul.f32 %v280_v14, %v274_v24  ;;  %v278_v29 = vmul.f32 %v276_v15, %v268_v25  ;;  %v296_v31 = vrot.slane %v283_v26, %v295_v23 }
 0x100   : > { %v284_v30 = vadd.f32 %v282_v27, %v278_v29 }
 0x102   : > { %v301_v32 = vrot.slane %v284_v30, %v300_v28 }
 0x104   : > { %v303_v33 = vsel %vm302_vm1, %v301_v32, %v296_v31 }
 0x105   : > { %528 = vmatmul.mubr.msk.f32.vlgmr.msra.gmra.mrb[0].mxu0 %vm304_vm2, %v303_v33 }
 0x1d8   : > { %v373_v35 = vpop.f32.mrb[0].mxu0 }
 0x1d9   : > { %v374_v36 = vadd.f32 %v373_v35, %v288_v34  ;;  %v529_v37 = vpop.f32.mrb[1].mxu0 }
 0x1db   : > { %v515_v38 = vmul.f32 -1.442695, %v374_v36 }
 0x1dd   : > { %623 = vpow2.f32 %v515_v38 }
 0x1e7   : > { %v624_v39 = vpop.eup %623 }
 0x1e8   : > { %v380_v40 = vadd.f32 1.0, %v624_v39 }
 0x1ea   : > { %625 = vrcp.f32 %v380_v40 }
 0x1f4   : > { %v626_v41 = vpop.eup %625 }
 0x1f5   : > { %384 = vst.msk [vmem:[%s230_s30] sm:$0x1] %vm383_vm3, %v626_v41 }
 0x1f6   : > { %711 = shalt.err (!%p708_p12)
}
 0x1f7   : > { %s712_s4 = scalar_lea.hbm %s1014_s27, 16  ;;  %s716_s7 = scalar_lea.hbm %s1066_s3, 32 }
 0x1f8   : > { %p713_p5 = scmp.ne.s32.totalorder %s1014_s27, %s712_s4  ;;  %p717_p10 = scmp.lt.u32.totalorder %s1014_s27, %s1066_s3 }
 0x1f9   : > { %p718_p2 = scmp.lt.u32.totalorder %s716_s7, %s712_s4  ;;  %p720_p13 = scmp.lt.u32.totalorder %s712_s4, %s1014_s27 }
 0x1fa   : > { %p714_p3 = pnand %p713_p5, %p1081_p4 }
 0x1fb   : > { %p719_p7 = por %p718_p2, %p717_p10 }
 0x1fc   : > { %p715_p6 = pneg %p714_p3 }
 0x1fd   : > { %p721_p11 = por %p720_p13, %p719_p7 }
 0x1ff   : > { %p722_p1 = pnand %p721_p11, %p715_p6 }
 0x201   : > { %725 = shalt.err (!%p722_p1)
}
 0x202   : > { %543 = dma.vmem_to_hbm [thread:$0]  (%p1081_p4), %s1016_s6, 16, %s1014_s27, %s386_s29  }
 0x203 PF: > { %s410_s8 = sand.u32 1, %s768_s12   ;;  %p1082_p0 = scmp.ne.s32.totalorder %s1074_s24, 0 }
 0x204   : > { %p1083_p8 = scmp.ge.s32.totalorder %s788_s17, 2  ;;  %s411_s10 = scalar_lea.sflag [#allocation6], %s410_s8 }
 0x206   : > { %p557_p9 = pnand %p1083_p8, %p1082_p0 }
 0x208   : > { %763 = dma.done.wait (!%p557_p9), %s411_s10, 16  }
 0x209   : > { %765 = vsyncadd (!%p557_p9), %s411_s10, 4294967280  ;;  %s21_s17 = sadd.s32 1, %s788_s17   ;;  %s1084_s12 = smov %s772_s13 }
 0x20a   : > { %p18_p12 = scmp.ge.s32.totalorder %s21_s17, 4   ;;  %s1085_s13 = smov %s776_s14 }
 0x20b   : > { %s1086_s14 = smov %s960_s9  ;;  %s1087_s15 = smov %s784_s16 }
 0x20c   : > { %s1088_s16 = smov %s1090_s19  ;;  %20 = sbr.rel (!%p18_p12) target bundleno = 8 (0x8), region = 95 }
 0x213   :  { %415 = vsyncpa [#allocation5], 1 }
 0x214   :  { %417 = vsyncpa [#allocation5 + $0x1], 1 }
 0x215   :  { %418 = vsyncpa [#allocation10], 1 }
 0x216   :  { %420 = vsyncpa [#allocation10 + $0x1], 1 }
 0x217   :  { %421 = vsyncpa [#allocation6], 1 }
 0x218   :  { %423 = vsyncpa [#allocation6 + $0x1], 1 }
 0x219   :  { %424 = vsyncpa [#allocation7], 1 }
 0x21a   :  { %426 = vsyncpa [#allocation7 + $0x1], 1 }

</bundles_post_ra>
